<compile_context>
chip_gen: v7x
topology: tpu7x:2x2x1
jax: 0.10.0
libtpu: 0.0.40
codegen_flags: <defaults>
</compile_context>

<pallas_src>
import jax
import jax.numpy as jnp
from jax.experimental import pallas as pl
from jax.experimental.pallas import tpu as pltpu


def _round_up(x, m):
    return (x + m - 1) // m * m


def basicnet_kernel(x_ref, w1_ref, b1_ref, w2_ref, b2_ref, out_ref, h_ref):
    # h = relu(x @ W1 + b1)   (all tiles are 128-lane padded, f32 accumulate)
    x = x_ref[...]
    h = jnp.dot(x, w1_ref[...], preferred_element_type=jnp.float32)
    h = jnp.maximum(h + b1_ref[...], 0.0)        # (1, hid_p) broadcasts over rows
    h_ref[...] = h.astype(h_ref.dtype)
    # out = h @ W2 + b2
    out = jnp.dot(h, w2_ref[...], preferred_element_type=jnp.float32)
    out_ref[...] = (out + b2_ref[...]).astype(out_ref.dtype)


def basicnet_forward(x, w1, b1, w2, b2, *, max_batch_tile=512):
    """y, h = BasicNet(x).  w1:(obs,hid) b1:(hid,) w2:(hid,out) b2:(out,)."""
    batch, obs_dim = x.shape
    hidden_dim = w1.shape[1]
    output_dim = w2.shape[1]

    # Lane-dense padded feature dims (multiples of 128).
    obs_p = _round_up(obs_dim, 128)
    hid_p = _round_up(hidden_dim, 128)
    out_p = _round_up(output_dim, 128)

    # Batch tile: sublane-aligned (multiple of 8), capped so VMEM stays small.
    tb = min(max_batch_tile, _round_up(batch, 8))
    batch_p = _round_up(batch, tb)

    def pad2(a, rows, cols):
        return jnp.pad(a, ((0, rows - a.shape[0]), (0, cols - a.shape[1])))

    # Zero padding is exact: padded W columns/rows and padded biases are zero,
    # so padded hidden/output lanes are relu(0)=0 and contribute nothing.
    x_p = pad2(x, batch_p, obs_p)
    w1_p = pad2(w1, obs_p, hid_p)
    b1_p = pad2(b1.reshape(1, -1), 1, hid_p)
    w2_p = pad2(w2, hid_p, out_p)
    b2_p = pad2(b2.reshape(1, -1), 1, out_p)

    grid = (batch_p // tb,)

    # Weights / biases: constant block index -> stay resident in VMEM across
    # all batch tiles.  Activations: tiled along the (parallel) batch axis.
    x_spec = pl.BlockSpec((tb, obs_p), lambda i: (i, 0))
    w1_spec = pl.BlockSpec((obs_p, hid_p), lambda i: (0, 0))
    b1_spec = pl.BlockSpec((1, hid_p), lambda i: (0, 0))
    w2_spec = pl.BlockSpec((hid_p, out_p), lambda i: (0, 0))
    b2_spec = pl.BlockSpec((1, out_p), lambda i: (0, 0))
    out_spec = pl.BlockSpec((tb, out_p), lambda i: (i, 0))
    h_spec = pl.BlockSpec((tb, hid_p), lambda i: (i, 0))

    logits_p, h_p = pl.pallas_call(
        basicnet_kernel,
        out_shape=(
            jax.ShapeDtypeStruct((batch_p, out_p), x.dtype),
            jax.ShapeDtypeStruct((batch_p, hid_p), x.dtype),
        ),
        grid_spec=pltpu.PrefetchScalarGridSpec(
            num_scalar_prefetch=0,
            grid=grid,
            in_specs=[x_spec, w1_spec, b1_spec, w2_spec, b2_spec],
            out_specs=[out_spec, h_spec],
        ),
        compiler_params=pltpu.CompilerParams(
            dimension_semantics=("parallel",),  # shard batch tiles across TCs (v7x)
        ),
    )(x_p, w1_p, b1_p, w2_p, b2_p)

    # Slice the lane-padded slabs back to the logical shapes.
    return logits_p[:batch, :output_dim], h_p[:batch, :hidden_dim]


def init_params(key, obs_dim, hidden_dim, output_dim, dtype=jnp.float32):
    # Deterministic init mimicking nn.Linear's uniform(-1/sqrt(fan_in), 1/sqrt(fan_in)).
    k1, k2, k3, k4 = jax.random.split(key, 4)
    s1 = 1.0 / jnp.sqrt(obs_dim)
    s2 = 1.0 / jnp.sqrt(hidden_dim)
    w1 = jax.random.uniform(k1, (obs_dim, hidden_dim), dtype, -s1, s1)
    b1 = jax.random.uniform(k2, (hidden_dim,), dtype, -s1, s1)
    w2 = jax.random.uniform(k3, (hidden_dim, output_dim), dtype, -s2, s2)
    b2 = jax.random.uniform(k4, (output_dim,), dtype, -s2, s2)
    return w1, b1, w2, b2


if __name__ == "__main__":
    obs_dim, hidden_dim, output_dim = 32, 32, 16
    batch = 8

    key = jax.random.PRNGKey(0)
    kx, kp = jax.random.split(key)
    x = jax.random.normal(kx, (batch, obs_dim), jnp.float32)
    w1, b1, w2, b2 = init_params(kp, obs_dim, hidden_dim, output_dim)

    logits, h = basicnet_forward(x, w1, b1, w2, b2)
    jax.block_until_ready((logits, h))

    # Reference check in plain JAX (same math as the PyTorch forward).
    h_ref = jnp.maximum(x @ w1 + b1[None, :], 0.0)
    logits_ref = h_ref @ w2 + b2[None, :]
    assert logits.shape == (batch, output_dim) and h.shape == (batch, hidden_dim)
    assert jnp.allclose(h, h_ref, atol=1e-5), "hidden mismatch"
    assert jnp.allclose(logits, logits_ref, atol=1e-5), "logits mismatch"

    print("KERNEL_OK")
</pallas_src>

<mosaic_0001>
module attributes {stable_mosaic.version = 11 : i64} {
  func.func @basicnet_kernel(%arg0: i32, %arg1: memref<8x128xf32, #tpu.memory_space<vmem>>, %arg2: memref<128x128xf32, #tpu.memory_space<vmem>>, %arg3: memref<1x128xf32, #tpu.memory_space<vmem>>, %arg4: memref<128x128xf32, #tpu.memory_space<vmem>>, %arg5: memref<1x128xf32, #tpu.memory_space<vmem>>, %arg6: memref<8x128xf32, #tpu.memory_space<vmem>>, %arg7: memref<8x128xf32, #tpu.memory_space<vmem>>) attributes {dimension_semantics = [#tpu.dimension_semantics<parallel>], iteration_bounds = array<i64: 1>, scalar_prefetch = 0 : i64, scratch_operands = 0 : i64, tpu.core_type = #tpu.core_type<tc>, window_params = [{transform_indices = @transform_0, window_bounds = array<i64: 8, 128>}, {pipeline_mode = #tpu.pipeline_mode<synchronous>, transform_indices = @transform_1, window_bounds = array<i64: 128, 128>}, {pipeline_mode = #tpu.pipeline_mode<synchronous>, transform_indices = @transform_2, window_bounds = array<i64: 1, 128>}, {pipeline_mode = #tpu.pipeline_mode<synchronous>, transform_indices = @transform_3, window_bounds = array<i64: 128, 128>}, {pipeline_mode = #tpu.pipeline_mode<synchronous>, transform_indices = @transform_4, window_bounds = array<i64: 1, 128>}, {transform_indices = @transform_5, window_bounds = array<i64: 8, 128>}, {transform_indices = @transform_6, window_bounds = array<i64: 8, 128>}]} {
    %c0 = arith.constant 0 : index
    %c0_0 = arith.constant 0 : index
    %0 = vector.load %arg1[%c0, %c0_0] : memref<8x128xf32, #tpu.memory_space<vmem>>, vector<8x128xf32>
    %c0_1 = arith.constant 0 : index
    %c0_2 = arith.constant 0 : index
    %1 = vector.load %arg2[%c0_1, %c0_2] : memref<128x128xf32, #tpu.memory_space<vmem>>, vector<128x128xf32>
    %cst = arith.constant dense<0.000000e+00> : vector<8x128xf32>
    %2 = tpu.matmul %0, %1, %cst {dimension_numbers = #tpu.dot_dimension_numbers<[1], [0], [0], [1], [0, 0, 1, 1], [], []>} : vector<8x128xf32>, vector<128x128xf32>, vector<8x128xf32> -> vector<8x128xf32>
    %c0_3 = arith.constant 0 : index
    %c0_4 = arith.constant 0 : index
    %3 = vector.load %arg3[%c0_3, %c0_4] : memref<1x128xf32, #tpu.memory_space<vmem>>, vector<1x128xf32>
    %4 = vector.broadcast %3 : vector<1x128xf32> to vector<8x128xf32>
    %5 = arith.addf %2, %4 : vector<8x128xf32>
    %cst_5 = arith.constant 0.000000e+00 : f32
    %6 = vector.broadcast %cst_5 : f32 to vector<8x128xf32>
    %7 = arith.maximumf %5, %6 : vector<8x128xf32>
    %c0_6 = arith.constant 0 : index
    %c0_7 = arith.constant 0 : index
    %8 = vector.load %arg7[%c0_6, %c0_7] : memref<8x128xf32, #tpu.memory_space<vmem>>, vector<8x128xf32>
    tpu.vector_store %arg7[%c0_6, %c0_7], %7 {strides = array<i32>} : memref<8x128xf32, #tpu.memory_space<vmem>>, vector<8x128xf32>,
    %c0_8 = arith.constant 0 : index
    %c0_9 = arith.constant 0 : index
    %9 = vector.load %arg4[%c0_8, %c0_9] : memref<128x128xf32, #tpu.memory_space<vmem>>, vector<128x128xf32>
    %cst_10 = arith.constant dense<0.000000e+00> : vector<8x128xf32>
    %10 = tpu.matmul %7, %9, %cst_10 {dimension_numbers = #tpu.dot_dimension_numbers<[1], [0], [0], [1], [0, 0, 1, 1], [], []>} : vector<8x128xf32>, vector<128x128xf32>, vector<8x128xf32> -> vector<8x128xf32>
    %c0_11 = arith.constant 0 : index
    %c0_12 = arith.constant 0 : index
    %11 = vector.load %arg5[%c0_11, %c0_12] : memref<1x128xf32, #tpu.memory_space<vmem>>, vector<1x128xf32>
    %12 = vector.broadcast %11 : vector<1x128xf32> to vector<8x128xf32>
    %13 = arith.addf %10, %12 : vector<8x128xf32>
    %c0_13 = arith.constant 0 : index
    %c0_14 = arith.constant 0 : index
    %14 = vector.load %arg6[%c0_13, %c0_14] : memref<8x128xf32, #tpu.memory_space<vmem>>, vector<8x128xf32>
    tpu.vector_store %arg6[%c0_13, %c0_14], %13 {strides = array<i32>} : memref<8x128xf32, #tpu.memory_space<vmem>>, vector<8x128xf32>,
    return
  }
  func.func @transform_0(%arg0: i32) -> (i32, i32) {
    %c0_i32 = arith.constant 0 : i32
    %c0_i32_0 = arith.constant 0 : i32
    return %arg0, %c0_i32 : i32, i32
  }
  func.func @transform_1(%arg0: i32) -> (i32, i32) {
    %c0_i32 = arith.constant 0 : i32
    %c0_i32_0 = arith.constant 0 : i32
    %c0_i32_1 = arith.constant 0 : i32
    return %c0_i32, %c0_i32_0 : i32, i32
  }
  func.func @transform_2(%arg0: i32) -> (i32, i32) {
    %c0_i32 = arith.constant 0 : i32
    %c0_i32_0 = arith.constant 0 : i32
    %c0_i32_1 = arith.constant 0 : i32
    return %c0_i32, %c0_i32_0 : i32, i32
  }
  func.func @transform_3(%arg0: i32) -> (i32, i32) {
    %c0_i32 = arith.constant 0 : i32
    %c0_i32_0 = arith.constant 0 : i32
    %c0_i32_1 = arith.constant 0 : i32
    return %c0_i32, %c0_i32_0 : i32, i32
  }
  func.func @transform_4(%arg0: i32) -> (i32, i32) {
    %c0_i32 = arith.constant 0 : i32
    %c0_i32_0 = arith.constant 0 : i32
    %c0_i32_1 = arith.constant 0 : i32
    return %c0_i32, %c0_i32_0 : i32, i32
  }
  func.func @transform_5(%arg0: i32) -> (i32, i32) {
    %c0_i32 = arith.constant 0 : i32
    %c0_i32_0 = arith.constant 0 : i32
    return %arg0, %c0_i32 : i32, i32
  }
  func.func @transform_6(%arg0: i32) -> (i32, i32) {
    %c0_i32 = arith.constant 0 : i32
    %c0_i32_0 = arith.constant 0 : i32
    return %arg0, %c0_i32 : i32, i32
  }
}

</mosaic_0001>

<bundles_post_ra>
// kernel: tpu_custom_call.1
= control target key start
LH: loop header
LB: loop body
LE: loop exit
PB: predicated region body
PF: predicated region fallthrough
CT: control target
= control target key end

     0   :  { %12 = vsyncpa [#allocation3], 0  ;;  %s698_s0 = inlined_call_operand.hbm [shape: f32[8,128], index: 0, kind: input, shape index: {}]   ;;  %s699_s1 = inlined_call_operand.hbm [shape: f32[128,128], index: 1, kind: input, shape index: {}]   ;;  %s700_s2 = inlined_call_operand.vmem [shape: f32[1,128], index: 2, kind: input, shape index: {}]   ;;  %s701_s3 = inlined_call_operand.hbm [shape: f32[128,128], index: 3, kind: input, shape index: {}]   ;;  %s702_s4 = inlined_call_operand.vmem [shape: f32[1,128], index: 4, kind: input, shape index: {}]   ;;  %s703_s5 = inlined_call_operand.hbm [shape: f32[8,128], index: 5, kind: output, shape index: {0}]   ;;  %s704_s6 = inlined_call_operand.hbm [shape: f32[8,128], index: 6, kind: output, shape index: {1}]  }
   0x1   :  { %13 = vsyncpa [#allocation6], 0 }
   0x2   :  { %14 = vsyncpa [#allocation4], 0 }
   0x3   :  { %15 = vsyncpa [#allocation10], 0  ;;  %s565_s21 = smov [#allocation5]   ;;  %s447_s25 = scalar_lea.hbm %s699_s1, 2048 }
   0x4   :  { %s31_s22 = sshll.u32 %s565_s21, 4  ;;  %p448_p0 = scmp.ne.s32.totalorder %s699_s1, %s447_s25  ;;  %s32_s22 = int_to_ptr.vmem [resolvable:$true] %s31_s22 }
   0x5   :  { %p451_p1 = scmp.lt.u32.totalorder %s447_s25, %s699_s1 }
   0x7   :  { %p453_p2 = pnand %p451_p1, %p448_p0 }
   0x9   :  { %456 = shalt.err (!%p453_p2)
}
   0xa   :  { %s457_s30 = scalar_lea.vmem %s32_s22, 2048  ;;  %p462_p4 = scmp.lt.s32.totalorder %s32_s22, %s32_s22 }
   0xb   :  { %p458_p3 = scmp.ne.s32.totalorder %s32_s22, %s457_s30  ;;  %p463_p5 = scmp.lt.s32.totalorder %s457_s30, %s457_s30 }
   0xd   :  { %p464_p6 = por %p463_p5, %p462_p4 }
   0xf   :  { %p465_p7 = pnand %p464_p6, %p458_p3 }
  0x11   :  { %468 = shalt.err (!%p465_p7)
}
  0x12   :  { %s566_s7 = smov 128   ;;  %s567_s8 = smov 8  }
  0x13   :  { %37 = dma.hbm_to_vmem [thread:$0]  %s699_s1, 2048, %s32_s22, [#allocation6], %s566_s7, %s566_s7, %s567_s8  }
  0x14   :  { %s568_s11 = smov [#allocation2]   ;;  %s569_s13 = smov [#allocation7]  }
  0x15   :  { %s22_s12 = sshll.u32 %s568_s11, 4  ;;  %s45_s14 = sshll.u32 %s569_s13, 4  ;;  %s23_s12 = int_to_ptr.vmem [resolvable:$true] %s22_s12  ;;  %s46_s14 = int_to_ptr.vmem [resolvable:$true] %s45_s14 }
  0x16   :  { %s469_s17 = scalar_lea.hbm %s698_s0, 128 }
  0x17   :  { %p470_p8 = scmp.ne.s32.totalorder %s698_s0, %s469_s17  ;;  %p473_p9 = scmp.lt.u32.totalorder %s469_s17, %s698_s0 }
  0x19   :  { %p475_p10 = pnand %p473_p9, %p470_p8 }
  0x1b   :  { %478 = shalt.err (!%p475_p10)
}
  0x1c   :  { %s479_s1 = scalar_lea.vmem %s23_s12, 128  ;;  %p484_p12 = scmp.lt.s32.totalorder %s23_s12, %s23_s12 }
  0x1d   :  { %p480_p11 = scmp.ne.s32.totalorder %s23_s12, %s479_s1  ;;  %p485_p13 = scmp.lt.s32.totalorder %s479_s1, %s479_s1 }
  0x1f   :  { %p486_p0 = por %p485_p13, %p484_p12 }
  0x21   :  { %p487_p1 = pnand %p486_p0, %p480_p11 }
  0x23   :  { %490 = shalt.err (!%p487_p1)
}
  0x24   :  { %25 = dma.hbm_to_vmem [thread:$0]  %s698_s0, 128, %s23_s12, [#allocation3]  }
  0x25   :  { %s491_s26 = scalar_lea.hbm %s701_s3, 2048 }
  0x26   :  { %p492_p2 = scmp.ne.s32.totalorder %s701_s3, %s491_s26  ;;  %p495_p3 = scmp.lt.u32.totalorder %s491_s26, %s701_s3 }
  0x28   :  { %p497_p4 = pnand %p495_p3, %p492_p2 }
  0x2a   :  { %500 = shalt.err (!%p497_p4)
}
  0x2b   :  { %s501_s9 = scalar_lea.vmem %s46_s14, 2048  ;;  %p506_p6 = scmp.lt.s32.totalorder %s46_s14, %s46_s14 }
  0x2c   :  { %p502_p5 = scmp.ne.s32.totalorder %s46_s14, %s501_s9  ;;  %p507_p7 = scmp.lt.s32.totalorder %s501_s9, %s501_s9 }
  0x2e   :  { %p508_p8 = por %p507_p7, %p506_p6 }
  0x30   :  { %p509_p9 = pnand %p508_p8, %p502_p5 }
  0x32   :  { %512 = shalt.err (!%p509_p9)
}
  0x33   :  { %51 = dma.hbm_to_vmem [thread:$0]  %s701_s3, 2048, %s46_s14, [#allocation6], %s566_s7, %s566_s7, %s567_s8  }
  0x34   :  { %557 = dma.done.wait [#allocation3], 128  }
  0x35   :  { %558 = vsyncadd [#allocation3], 4294967168 }
  0x36   :  { %559 = dma.done.wait [#allocation6], 4096  }
  0x37   :  { %560 = vsyncadd [#allocation6], 4294963200  ;;  %v570_v0 = vmov 0.0|0.0   ;;  %vm571_vm0 = vmmov 0   ;;  %v572_v1 = vmov 0.0   ;;  %v64_v2 = vld [vmem:[#allocation5] sm:$0xff] }
  0x38   :  { %389 = vmatprep.subr.bf16.mxu0 %v570_v0  ;;  %351 = vmatprep.mubr.msk.f32.mxu0 %vm571_vm0, %v572_v1  ;;  %v65_v3 = vld [vmem:[#allocation5 + $0x8] sm:$0xff]  ;;  %v66_v4 = vld [vmem:[#allocation5 + $0x10] sm:$0xff]  ;;  %v67_v6 = vld [vmem:[#allocation5 + $0x18] sm:$0xff]  ;;  %s573_s8 = smov [#allocation9]  }
  0x39   :  { %413 = vmatprep.subr.bf16.mxu1 %v570_v0  ;;  %386 = vmatprep.mubr.msk.f32.mxu1 %vm571_vm0, %v572_v1  ;;  %v390_v5 = vpack.c.bf16 %v65_v3, %v64_v2  ;;  %v393_v7 = vpack.c.bf16 %v67_v6, %v66_v4  ;;  %v68_v8 = vld [vmem:[#allocation5 + $0x20] sm:$0xff]  ;;  %v69_v9 = vld [vmem:[#allocation5 + $0x28] sm:$0xff]  ;;  %v161_v12 = vld [vmem:[#allocation7 + $0x10] sm:$0xff]  ;;  %s269_s11 = sshll.u32 %s573_s8, 4  ;;  %s270_s11 = int_to_ptr.vmem [resolvable:$true] %s269_s11 }
  0x3a   :  { %v159_v10 = vld [vmem:[#allocation7] sm:$0xff]  ;;  %v160_v11 = vld [vmem:[#allocation7 + $0x8] sm:$0xff]  ;;  %v162_v13 = vld [vmem:[#allocation7 + $0x18] sm:$0xff]  ;;  %v396_v14 = vpack.c.bf16 %v69_v9, %v68_v8  ;;  %s513_s12 = scalar_lea.vmem %s270_s11, 128  ;;  %p518_p11 = scmp.lt.s32.totalorder %s270_s11, %s270_s11 }
  0x3b   :  { %391 = vmatpush3.bf16.msra.mxu0 %v390_v5  ;;  %v414_v15 = vpack.c.bf16 %v160_v11, %v159_v10  ;;  %v70_v16 = vld [vmem:[#allocation5 + $0x30] sm:$0xff]  ;;  %v71_v17 = vld [vmem:[#allocation5 + $0x38] sm:$0xff]  ;;  %v417_v18 = vpack.c.bf16 %v162_v13, %v161_v12  ;;  %v163_v19 = vld [vmem:[#allocation7 + $0x20] sm:$0xff]  ;;  %p514_p10 = scmp.ne.s32.totalorder %s270_s11, %s513_s12  ;;  %p519_p12 = scmp.lt.s32.totalorder %s513_s12, %s513_s12 }
  0x3c   :  { %392 = vmatprep.subr.bf16.mxu0 %v570_v0  ;;  %v164_v20 = vld [vmem:[#allocation7 + $0x28] sm:$0xff]  ;;  %v399_v21 = vpack.c.bf16 %v71_v17, %v70_v16  ;;  %v72_v22 = vld [vmem:[#allocation5 + $0x40] sm:$0xff]  ;;  %v165_v25 = vld [vmem:[#allocation7 + $0x30] sm:$0xff] }
  0x3d   :  { %415 = vmatpush3.bf16.msra.mxu1 %v414_v15  ;;  %v73_v23 = vld [vmem:[#allocation5 + $0x48] sm:$0xff]  ;;  %v420_v24 = vpack.c.bf16 %v164_v20, %v163_v19  ;;  %v166_v26 = vld [vmem:[#allocation7 + $0x38] sm:$0xff]  ;;  %v74_v28 = vld [vmem:[#allocation5 + $0x50] sm:$0xff]  ;;  %p520_p13 = por %p519_p12, %p518_p11 }
  0x3e   :  { %416 = vmatprep.subr.bf16.mxu1 %v570_v0  ;;  %v402_v27 = vpack.c.bf16 %v73_v23, %v72_v22  ;;  %v75_v29 = vld [vmem:[#allocation5 + $0x58] sm:$0xff]  ;;  %v423_v30 = vpack.c.bf16 %v166_v26, %v165_v25  ;;  %v167_v31 = vld [vmem:[#allocation7 + $0x40] sm:$0xff]  ;;  %v168_v32 = vld [vmem:[#allocation7 + $0x48] sm:$0xff] }
  0x3f   :  { %394 = vmatpush3.bf16.msra.mxu0 %v393_v7  ;;  %v405_v33 = vpack.c.bf16 %v75_v29, %v74_v28  ;;  %v76_v34 = vld [vmem:[#allocation5 + $0x60] sm:$0xff]  ;;  %v77_v35 = vld [vmem:[#allocation5 + $0x68] sm:$0xff]  ;;  %v426_v36 = vpack.c.bf16 %v168_v32, %v167_v31  ;;  %v169_v37 = vld [vmem:[#allocation7 + $0x50] sm:$0xff]  ;;  %p521_p0 = pnand %p520_p13, %p514_p10 }
  0x40   :  { %395 = vmatprep.subr.bf16.mxu0 %v570_v0  ;;  %v170_v38 = vld [vmem:[#allocation7 + $0x58] sm:$0xff]  ;;  %v408_v39 = vpack.c.bf16 %v77_v35, %v76_v34  ;;  %v78_v40 = vld [vmem:[#allocation5 + $0x70] sm:$0xff]  ;;  %v171_v43 = vld [vmem:[#allocation7 + $0x60] sm:$0xff] }
  0x41   :  { %418 = vmatpush3.bf16.msra.mxu1 %v417_v18  ;;  %v79_v41 = vld [vmem:[#allocation5 + $0x78] sm:$0xff]  ;;  %v429_v42 = vpack.c.bf16 %v170_v38, %v169_v37  ;;  %v172_v44 = vld [vmem:[#allocation7 + $0x68] sm:$0xff]  ;;  %v173_v48 = vld [vmem:[#allocation7 + $0x70] sm:$0xff] }
  0x42   :  { %419 = vmatprep.subr.bf16.mxu1 %v570_v0  ;;  %v411_v45 = vpack.c.bf16 %v79_v41, %v78_v40  ;;  %v432_v46 = vpack.c.bf16 %v172_v44, %v171_v43  ;;  %v63_v47 = vld [vmem:[#allocation2] sm:$0xff] }
  0x43   :  { %397 = vmatpush3.bf16.msra.mxu0 %v396_v14  ;;  %v174_v49 = vld [vmem:[#allocation7 + $0x78] sm:$0xff] }
  0x44   :  { %398 = vmatprep.subr.bf16.mxu0 %v570_v0  ;;  %v435_v50 = vpack.c.bf16 %v174_v49, %v173_v48  ;;  %v283_v51 = vld [vmem:[%s700_s2] ss:$0 sm:$0xff] }
  0x45   :  { %421 = vmatpush3.bf16.msra.mxu1 %v420_v24 }
  0x46   :  { %422 = vmatprep.subr.bf16.mxu1 %v570_v0 }
  0x47   :  { %400 = vmatpush3.bf16.msra.mxu0 %v399_v21 }
  0x48   :  { %401 = vmatprep.subr.bf16.mxu0 %v570_v0 }
  0x49   :  { %424 = vmatpush3.bf16.msra.mxu1 %v423_v30 }
  0x4a   :  { %425 = vmatprep.subr.bf16.mxu1 %v570_v0 }
  0x4b   :  { %403 = vmatpush3.bf16.msra.mxu0 %v402_v27 }
  0x4c   :  { %404 = vmatprep.subr.bf16.mxu0 %v570_v0 }
  0x4d   :  { %427 = vmatpush3.bf16.msra.mxu1 %v426_v36 }
  0x4e   :  { %428 = vmatprep.subr.bf16.mxu1 %v570_v0 }
  0x4f   :  { %406 = vmatpush3.bf16.msra.mxu0 %v405_v33 }
  0x50   :  { %407 = vmatprep.subr.bf16.mxu0 %v570_v0 }
  0x51   :  { %430 = vmatpush3.bf16.msra.mxu1 %v429_v42 }
  0x52   :  { %431 = vmatprep.subr.bf16.mxu1 %v570_v0 }
  0x53   :  { %409 = vmatpush3.bf16.msra.mxu0 %v408_v39 }
  0x54   :  { %410 = vmatprep.subr.bf16.mxu0 %v570_v0 }
  0x55   :  { %433 = vmatpush3.bf16.msra.mxu1 %v432_v46 }
  0x56   :  { %434 = vmatprep.subr.bf16.mxu1 %v570_v0 }
  0x57   :  { %412 = vmatpush3.bf16.msra.mxu0 %v411_v45 }
  0x59   :  { %436 = vmatpush3.bf16.msra.mxu1 %v435_v50 }
  0x5a   :  { %352 = vmatmul.mubr.f32.vlgmr.msra.gmra.mrb[0].mxu0 %v63_v47 }
 0x12d   :  { %v153_v52 = vpop.f32.mrb[0].mxu0 }
 0x12e   :  { %v154_v53 = vadd.f32 %v283_v51, %v153_v52  ;;  %v353_v54 = vpop.f32.mrb[1].mxu0 }
 0x130   :  { %v157_v55 = vmax.f32 %v154_v53, 0.0 }
 0x132   :  { %158 = vst [vmem:[#allocation9] sm:$0xff] %v157_v55  ;;  %387 = vmatmul.mubr.f32.vlgmr.msra.gmra.mrb[0].mxu1 %v157_v55 }
 0x133   :  { %524 = shalt.err (!%p521_p0)
}
 0x134   :  { %s525_s2 = scalar_lea.hbm %s704_s6, 128 }
 0x135   :  { %p526_p1 = scmp.ne.s32.totalorder %s704_s6, %s525_s2  ;;  %p529_p2 = scmp.lt.u32.totalorder %s525_s2, %s704_s6 }
 0x137   :  { %p531_p3 = pnand %p529_p2, %p526_p1 }
 0x139   :  { %534 = shalt.err (!%p531_p3)
}
 0x13a   :  { %272 = dma.vmem_to_hbm [thread:$0]  %s270_s11, 128, %s704_s6, [#allocation10]   ;;  %v284_v56 = vld [vmem:[%s702_s4] ss:$0 sm:$0xff] }
 0x13b   :  { %s574_s22 = smov [#allocation8]  }
 0x13c   :  { %s259_s23 = sshll.u32 %s574_s22, 4  ;;  %s260_s23 = int_to_ptr.vmem [resolvable:$true] %s259_s23 }
 0x13d   :  { %s535_s24 = scalar_lea.vmem %s260_s23, 128  ;;  %p540_p5 = scmp.lt.s32.totalorder %s260_s23, %s260_s23 }
 0x13e   :  { %p536_p4 = scmp.ne.s32.totalorder %s260_s23, %s535_s24  ;;  %p541_p6 = scmp.lt.s32.totalorder %s535_s24, %s535_s24 }
 0x140   :  { %p542_p7 = por %p541_p6, %p540_p5 }
 0x142   :  { %p543_p8 = pnand %p542_p7, %p536_p4 }
 0x205   :  { %v248_v57 = vpop.f32.mrb[0].mxu1 }
 0x206   :  { %v249_v58 = vadd.f32 %v284_v56, %v248_v57  ;;  %v388_v59 = vpop.f32.mrb[1].mxu1 }
 0x208   :  { %252 = vst [vmem:[#allocation8] sm:$0xff] %v249_v58 }
 0x209   :  { %546 = shalt.err (!%p543_p8)
}
 0x20a   :  { %s547_s26 = scalar_lea.hbm %s703_s5, 128 }
 0x20b   :  { %p548_p9 = scmp.ne.s32.totalorder %s703_s5, %s547_s26  ;;  %p551_p10 = scmp.lt.u32.totalorder %s547_s26, %s703_s5 }
 0x20d   :  { %p553_p11 = pnand %p551_p10, %p548_p9 }
 0x20f   :  { %556 = shalt.err (!%p553_p11)
}
 0x210   :  { %262 = dma.vmem_to_hbm [thread:$0]  %s260_s23, 128, %s703_s5, [#allocation4]  }
 0x211   :  { %561 = dma.done.wait [#allocation4], 128  }
 0x212   :  { %562 = vsyncadd [#allocation4], 4294967168 }
 0x213   :  { %563 = dma.done.wait [#allocation10], 128  }
 0x214   :  { %564 = vsyncadd [#allocation10], 4294967168 }
 0x215   :  { %279 = vsyncpa [#allocation3], 1 }
 0x216   :  { %280 = vsyncpa [#allocation6], 1 }
 0x217   :  { %281 = vsyncpa [#allocation4], 1 }
 0x218   :  { %282 = vsyncpa [#allocation10], 1 }

</bundles_post_ra>
